<compile_context>
chip_gen: v7x
topology: tpu7x:2x2x1
jax: 0.10.0
libtpu: 0.0.40
codegen_flags: <defaults>
</compile_context>

<pallas_src>
import math

import jax
import jax.numpy as jnp
from jax.experimental import pallas as pl
from jax.experimental.pallas import tpu as pltpu

_MIB = 1024 * 1024


def _copy_kernel(x_ref, o_ref):
    # Pure lane-dense identity copy of one tile (no in-kernel reshape/relayout).
    o_ref[...] = x_ref[...]


def _pick_row_block(R, row_bytes, sub, target_bytes):
    """Rows per block: multiple of `sub`, block bytes <= target, >=2 blocks when possible."""
    if R <= sub:
        return R  # full extent (legal even if not a multiple of 8)
    max_rows = max(sub, (target_bytes // max(row_bytes, 1)) // sub * sub)
    br = min(max_rows, R)
    if br < R:
        br = max(sub, br // sub * sub)
    if -(-R // br) < 2:
        # Split into >= 2 blocks so ("parallel",) can shard the copy across
        # both TensorCores on v7x (neutral on v5e/v6e).
        half = -(-R // 2)
        br = ((half + sub - 1) // sub) * sub
    return br


def _launch_copy(x2, block_shape, grid, index_map, dim_sems, donate):
    R, C = x2.shape
    itemsize = jnp.dtype(x2.dtype).itemsize
    block_bytes = math.prod(block_shape) * itemsize
    # Enough for double-buffered in + out with headroom, capped for v7x (64 MiB
    # physical VMEM); v5e/v6e (128 MiB physical) are always fine with this cap.
    vmem_limit = int(min(64 * _MIB, max(32 * _MIB, 5 * block_bytes)))
    return pl.pallas_call(
        _copy_kernel,
        out_shape=jax.ShapeDtypeStruct((R, C), x2.dtype),
        grid=grid,
        in_specs=[pl.BlockSpec(block_shape, index_map)],
        out_specs=pl.BlockSpec(block_shape, index_map),
        input_output_aliases={0: 0} if donate else {},
        compiler_params=pltpu.CompilerParams(
            dimension_semantics=dim_sems,
            vmem_limit_bytes=vmem_limit,
        ),
    )(x2)


def flatten(x, *, target_block_bytes=8 * _MIB, use_pallas=True, donate=False):
    """Pallas equivalent of torch Flatten: (B, ...) -> (B, prod(rest)).

    For standalone use prefer `use_pallas=False` (metadata-only reshape).
    Set `donate=True` to alias the output onto the input buffer (only if the
    caller no longer needs x) to halve peak HBM footprint.
    """
    B = x.shape[0]
    N = math.prod(x.shape[1:]) if x.ndim > 1 else 1
    M = B * N

    # TODO(synk): standalone, the copy kernel is pure HBM-bandwidth overhead;
    # keep the pallas path only when fused into a consumer kernel.
    if not use_pallas or M == 0:
        return jnp.reshape(x, (B, N))

    itemsize = jnp.dtype(x.dtype).itemsize
    # Dtype-aware sublane alignment: f32 -> 8, bf16 -> 16, int8/fp8 -> 32.
    sub = max(8, 32 // itemsize)

    if M % 128 == 0:
        # ---- preferred path: contiguous row blocks over a flat (R, C) view ----
        # Lane width C = 128*f: largest 128-multiple divisor of M with a row no
        # bigger than ~64 KiB, preferring views tall enough (R >= sub) to fill
        # whole vregs.  Row blocks of this row-major view are single contiguous
        # HBM regions -> burst-efficient DMAs.
        f_total = M // 128
        f_cap = max(1, min(f_total, (64 * 1024 // itemsize) // 128))
        divisors = [d for d in range(1, f_cap + 1) if f_total % d == 0]
        tall = [d for d in divisors if M // (128 * d) >= sub]
        f = max(tall) if tall else max(divisors)
        C = 128 * f
        R = M // C
        x2 = jnp.reshape(x, (R, C))  # free, metadata-only, order-preserving
        br = _pick_row_block(R, C * itemsize, sub, target_block_bytes)
        out2 = _launch_copy(
            x2, (br, C), (pl.cdiv(R, br),), lambda i: (i, 0), ("parallel",), donate
        )
    else:
        # ---- fallback: (B, N) view, last dim at full extent ----
        x2 = jnp.reshape(x, (B, N))
        if min(B, sub) * N * itemsize <= 12 * _MIB:
            br = _pick_row_block(B, N * itemsize, sub, target_block_bytes)
            out2 = _launch_copy(
                x2, (br, N), (pl.cdiv(B, br),), lambda i: (i, 0), ("parallel",), donate
            )
        else:
            # Huge, non-128-aligned rows: bound VMEM with a 2-D grid and a
            # masked tail column block.
            # TODO(synk): column chunks of a row-major view are strided DMAs;
            # this branch only exists so awkward shapes still compile/fit VMEM.
            br = sub if B > sub else B
            bc = max(128, (target_block_bytes // max(br * itemsize, 1)) // 128 * 128)
            bc = min(bc, pl.cdiv(N, 128) * 128)
            out2 = _launch_copy(
                x2,
                (br, bc),
                (pl.cdiv(B, br), pl.cdiv(N, bc)),
                lambda i, j: (i, j),
                ("parallel", "parallel"),
                donate,
            )

    return jnp.reshape(out2, (B, N))  # free, metadata-only reshape back


if __name__ == "__main__":
    key = jax.random.PRNGKey(0)
    B, C, H, W = 2, 4, 16, 16
    x = jax.random.normal(key, (B, C, H, W), dtype=jnp.float32)

    out = jax.block_until_ready(flatten(x))

    # Reference: plain row-major reshape (same semantics as torch .view(B, -1))
    ref = jnp.reshape(x, (B, -1))
    assert out.shape == (B, C * H * W), out.shape
    assert out.dtype == x.dtype
    assert jnp.array_equal(out, ref), "Pallas flatten mismatch vs reference"

    print("KERNEL_OK")
</pallas_src>

<mosaic_0001>
module attributes {stable_mosaic.version = 11 : i64} {
  func.func @_copy_kernel(%arg0: i32, %arg1: memref<8x256xf32, #tpu.memory_space<vmem>>, %arg2: memref<8x256xf32, #tpu.memory_space<vmem>>) attributes {dimension_semantics = [#tpu.dimension_semantics<parallel>], iteration_bounds = array<i64: 1>, scalar_prefetch = 0 : i64, scratch_operands = 0 : i64, tpu.core_type = #tpu.core_type<tc>, window_params = [{transform_indices = @transform_0, window_bounds = array<i64: 8, 256>}, {transform_indices = @transform_1, window_bounds = array<i64: 8, 256>}]} {
    %c0 = arith.constant 0 : index
    %c0_0 = arith.constant 0 : index
    %0 = vector.load %arg1[%c0, %c0_0] : memref<8x256xf32, #tpu.memory_space<vmem>>, vector<8x256xf32>
    %c0_1 = arith.constant 0 : index
    %c0_2 = arith.constant 0 : index
    %1 = vector.load %arg2[%c0_1, %c0_2] : memref<8x256xf32, #tpu.memory_space<vmem>>, vector<8x256xf32>
    tpu.vector_store %arg2[%c0_1, %c0_2], %0 {strides = array<i32>} : memref<8x256xf32, #tpu.memory_space<vmem>>, vector<8x256xf32>,
    return
  }
  func.func @transform_0(%arg0: i32) -> (i32, i32) {
    %c0_i32 = arith.constant 0 : i32
    %c0_i32_0 = arith.constant 0 : i32
    return %arg0, %c0_i32 : i32, i32
  }
  func.func @transform_1(%arg0: i32) -> (i32, i32) {
    %c0_i32 = arith.constant 0 : i32
    %c0_i32_0 = arith.constant 0 : i32
    return %arg0, %c0_i32 : i32, i32
  }
}

</mosaic_0001>

<bundles_post_ra>
// kernel: tpu_custom_call.1
= control target key start
LH: loop header
LB: loop body
LE: loop exit
PB: predicated region body
PF: predicated region fallthrough
CT: control target
= control target key end

     0   :  { %6 = vsyncpa [#allocation3], 0  ;;  %s126_s0 = inlined_call_operand.hbm [shape: f32[8,256], index: 0, kind: input, shape index: {}]   ;;  %s127_s1 = inlined_call_operand.hbm [shape: f32[8,256], index: 1, kind: output, shape index: {}]  }
   0x1   :  { %7 = vsyncpa [#allocation4], 0  ;;  %s90_s6 = smov [#allocation2]   ;;  %s42_s10 = scalar_lea.hbm %s126_s0, 256 }
   0x2   :  { %s14_s7 = sshll.u32 %s90_s6, 4  ;;  %p43_p0 = scmp.ne.s32.totalorder %s126_s0, %s42_s10  ;;  %s15_s7 = int_to_ptr.vmem [resolvable:$true] %s14_s7 }
   0x3   :  { %p46_p1 = scmp.lt.u32.totalorder %s42_s10, %s126_s0 }
   0x5   :  { %p48_p2 = pnand %p46_p1, %p43_p0 }
   0x7   :  { %51 = shalt.err (!%p48_p2)
}
   0x8   :  { %s52_s15 = scalar_lea.vmem %s15_s7, 256  ;;  %p57_p4 = scmp.lt.s32.totalorder %s15_s7, %s15_s7 }
   0x9   :  { %p53_p3 = scmp.ne.s32.totalorder %s15_s7, %s52_s15  ;;  %p58_p5 = scmp.lt.s32.totalorder %s52_s15, %s52_s15 }
   0xb   :  { %p59_p6 = por %p58_p5, %p57_p4 }
   0xd   :  { %p60_p7 = pnand %p59_p6, %p53_p3 }
   0xf   :  { %63 = shalt.err (!%p60_p7)
}
  0x10   :  { %17 = dma.hbm_to_vmem [thread:$0]  %s126_s0, 256, %s15_s7, [#allocation3]  }
  0x11   :  { %86 = dma.done.wait [#allocation3], 256  }
  0x12   :  { %87 = vsyncadd [#allocation3], 4294967040  ;;  %s91_s18 = smov [#allocation5]   ;;  %v21_v0 = vld [vmem:[#allocation2] sm:$0xff]  ;;  %v22_v1 = vld [vmem:[#allocation2 + $0x8] sm:$0xff] }
  0x13   :  { %s31_s19 = sshll.u32 %s91_s18, 4  ;;  %23 = vst [vmem:[#allocation5] sm:$0xff] %v21_v0  ;;  %24 = vst [vmem:[#allocation5 + $0x8] sm:$0xff] %v22_v1  ;;  %s32_s19 = int_to_ptr.vmem [resolvable:$true] %s31_s19 }
  0x14   :  { %s64_s20 = scalar_lea.vmem %s32_s19, 256  ;;  %p69_p9 = scmp.lt.s32.totalorder %s32_s19, %s32_s19 }
  0x15   :  { %p65_p8 = scmp.ne.s32.totalorder %s32_s19, %s64_s20  ;;  %p70_p10 = scmp.lt.s32.totalorder %s64_s20, %s64_s20 }
  0x17   :  { %p71_p11 = por %p70_p10, %p69_p9 }
  0x19   :  { %p72_p12 = pnand %p71_p11, %p65_p8 }
  0x1b   :  { %75 = shalt.err (!%p72_p12)
}
  0x1c   :  { %s76_s0 = scalar_lea.hbm %s127_s1, 256 }
  0x1d   :  { %p77_p13 = scmp.ne.s32.totalorder %s127_s1, %s76_s0  ;;  %p80_p0 = scmp.lt.u32.totalorder %s76_s0, %s127_s1 }
  0x1f   :  { %p82_p1 = pnand %p80_p0, %p77_p13 }
  0x21   :  { %85 = shalt.err (!%p82_p1)
}
  0x22   :  { %34 = dma.vmem_to_hbm [thread:$0]  %s32_s19, 256, %s127_s1, [#allocation4]  }
  0x23   :  { %88 = dma.done.wait [#allocation4], 256  }
  0x24   :  { %89 = vsyncadd [#allocation4], 4294967040 }
  0x25   :  { %38 = vsyncpa [#allocation3], 1 }
  0x26   :  { %39 = vsyncpa [#allocation4], 1 }

</bundles_post_ra>
